<compile_context>
chip_gen: v5e
topology: v5e:2x2
jax: 0.10.0
libtpu: 0.0.40
codegen_flags: <defaults>
</compile_context>

<pallas_src>
import math
import functools

import jax
import jax.numpy as jnp
from jax import lax
from jax.experimental import pallas as pl
from jax.experimental.pallas import tpu as pltpu

LOG_SIG_MAX = 2.0
LOG_SIG_MIN = -20.0


def _gaussian_policy_kernel(state_ref, w1_ref, w2_ref, wh_ref, b_ref, out_ref,
                            *, head_pad):
    hidden = w1_ref.shape[1]
    out_w = wh_ref.shape[1]

    x = state_ref[...]

    # Packed biases: row 0 = b1, row 1 = b2, row 2 = fused-head bias.
    b1 = b_ref[0:1, :hidden]
    b2 = b_ref[1:2, :hidden]
    bh = b_ref[2:3, :out_w]

    # linear1 + ReLU
    h1 = jnp.maximum(
        jnp.dot(x, w1_ref[...], preferred_element_type=jnp.float32) + b1, 0.0)

    # linear2 + ReLU
    h2 = jnp.maximum(
        jnp.dot(h1, w2_ref[...], preferred_element_type=jnp.float32) + b2, 0.0)

    # Fused mean / log_std head: one matmul, one lane-dense (batch, 256) store.
    heads = jnp.dot(h2, wh_ref[...], preferred_element_type=jnp.float32) + bh

    # Clamp only the log_std half (lanes >= head_pad); mean lanes untouched.
    col = lax.broadcasted_iota(jnp.int32, heads.shape, 1)
    clamped = jnp.clip(heads, LOG_SIG_MIN, LOG_SIG_MAX)
    out_ref[...] = jnp.where(col >= head_pad, clamped, heads)


def pack_gaussian_policy_params(params, num_actions):
    """Host-side, once: fuse head weights/biases into lane-dense slabs."""
    hidden = params["w1"].shape[1]
    head_pad = max(128, ((num_actions + 127) // 128) * 128)
    width = max(2 * head_pad, hidden)

    wh = jnp.zeros((hidden, 2 * head_pad), jnp.float32)
    wh = wh.at[:, :num_actions].set(params["wm"])
    wh = wh.at[:, head_pad:head_pad + num_actions].set(params["ws"])

    b = jnp.zeros((3, width), jnp.float32)
    b = b.at[0, :hidden].set(params["b1"][0])
    b = b.at[1, :hidden].set(params["b2"][0])
    b = b.at[2, :num_actions].set(params["bm"][0])
    b = b.at[2, head_pad:head_pad + num_actions].set(params["bs"][0])

    return {"w1": params["w1"], "w2": params["w2"], "wh": wh, "b": b}


def gaussian_policy_forward(state, packed, *, num_actions, block_rows=512):
    """Runs GaussianPolicy.forward. Returns (mean, log_std)."""
    batch, n_in = state.shape
    hidden = packed["w1"].shape[1]
    out_w = packed["wh"].shape[1]
    head_pad = out_w // 2

    kernel = functools.partial(_gaussian_policy_kernel, head_pad=head_pad)

    flops = 2 * batch * (n_in * hidden + hidden * hidden + hidden * out_w)
    bytes_accessed = 4 * (state.size + packed["w1"].size + packed["w2"].size
                          + packed["wh"].size + packed["b"].size
                          + batch * out_w)
    cost = pl.CostEstimate(flops=flops, transcendentals=0,
                           bytes_accessed=bytes_accessed)

    if batch >= 2 * block_rows and batch % block_rows == 0:
        # Large-batch path: parallel grid over rows (2x on v7x megacore,
        # pipelined state DMA on v5e/v6e). Weights pinned to one block.
        out = pl.pallas_call(
            kernel,
            out_shape=jax.ShapeDtypeStruct((batch, out_w), jnp.float32),
            grid_spec=pltpu.PrefetchScalarGridSpec(
                num_scalar_prefetch=0,
                grid=(batch // block_rows,),
                in_specs=[
                    pl.BlockSpec((block_rows, n_in), lambda i: (i, 0)),
                    pl.BlockSpec(packed["w1"].shape, lambda i: (0, 0)),
                    pl.BlockSpec(packed["w2"].shape, lambda i: (0, 0)),
                    pl.BlockSpec(packed["wh"].shape, lambda i: (0, 0)),
                    pl.BlockSpec(packed["b"].shape, lambda i: (0, 0)),
                ],
                out_specs=pl.BlockSpec((block_rows, out_w), lambda i: (i, 0)),
            ),
            compiler_params=pltpu.CompilerParams(
                dimension_semantics=("parallel",)),
            cost_estimate=cost,
        )(state, packed["w1"], packed["w2"], packed["wh"], packed["b"])
    else:
        # Tiny-batch path: everything fits in VMEM, block == array, no grid.
        vmem = pl.BlockSpec(memory_space=pltpu.MemorySpace.VMEM)
        out = pl.pallas_call(
            kernel,
            out_shape=jax.ShapeDtypeStruct((batch, out_w), jnp.float32),
            in_specs=[vmem] * 5,
            out_specs=vmem,
            cost_estimate=cost,
        )(state, packed["w1"], packed["w2"], packed["wh"], packed["b"])

    mean = out[:, :num_actions]
    log_std = out[:, head_pad:head_pad + num_actions]
    return mean, log_std


def _xavier_uniform(key, fan_in, fan_out, gain=1.0):
    # Matches torch.nn.init.xavier_uniform_; stored as [in, out] (transposed
    # relative to torch's [out, in] weight layout).
    bound = gain * math.sqrt(6.0 / (fan_in + fan_out))
    return jax.random.uniform(key, (fan_in, fan_out), jnp.float32, -bound, bound)


def init_gaussian_policy_params(key, num_inputs, num_actions, hidden_dim):
    k1, k2, k3, k4 = jax.random.split(key, 4)
    return {
        "w1": _xavier_uniform(k1, num_inputs, hidden_dim),
        "b1": jnp.zeros((1, hidden_dim), jnp.float32),
        "w2": _xavier_uniform(k2, hidden_dim, hidden_dim),
        "b2": jnp.zeros((1, hidden_dim), jnp.float32),
        "wm": _xavier_uniform(k3, hidden_dim, num_actions),
        "bm": jnp.zeros((1, num_actions), jnp.float32),
        "ws": _xavier_uniform(k4, hidden_dim, num_actions),
        "bs": jnp.zeros((1, num_actions), jnp.float32),
    }


def _reference_forward(state, p):
    h1 = jnp.maximum(state @ p["w1"] + p["b1"], 0.0)
    h2 = jnp.maximum(h1 @ p["w2"] + p["b2"], 0.0)
    mean = h2 @ p["wm"] + p["bm"]
    log_std = jnp.clip(h2 @ p["ws"] + p["bs"], LOG_SIG_MIN, LOG_SIG_MAX)
    return mean, log_std


if __name__ == "__main__":
    # Small shapes consistent with the module's constructor.
    num_inputs = 8
    num_actions = 4
    hidden_dim = 32

    key = jax.random.PRNGKey(0)
    pkey, skey, skey2 = jax.random.split(key, 3)

    params = init_gaussian_policy_params(pkey, num_inputs, num_actions, hidden_dim)
    packed = pack_gaussian_policy_params(params, num_actions)

    fwd = jax.jit(functools.partial(gaussian_policy_forward,
                                    num_actions=num_actions))

    # 1) tiny-batch (gridless) path
    state = jax.random.normal(skey, (2, num_inputs), jnp.float32)
    mean, log_std = fwd(state, packed)
    jax.block_until_ready((mean, log_std))
    ref_mean, ref_log_std = _reference_forward(state, params)
    assert jnp.allclose(mean, ref_mean, atol=1e-5), "mean mismatch (small batch)"
    assert jnp.allclose(log_std, ref_log_std, atol=1e-5), "log_std mismatch (small batch)"

    # 2) large-batch (parallel grid) path
    state_big = jax.random.normal(skey2, (1024, num_inputs), jnp.float32)
    mean_b, log_std_b = fwd(state_big, packed)
    jax.block_until_ready((mean_b, log_std_b))
    ref_mean_b, ref_log_std_b = _reference_forward(state_big, params)
    assert jnp.allclose(mean_b, ref_mean_b, atol=1e-5), "mean mismatch (big batch)"
    assert jnp.allclose(log_std_b, ref_log_std_b, atol=1e-5), "log_std mismatch (big batch)"

    # TODO(synk): GaussianPolicy.sample() (rsample/tanh-squash/log_prob) is not
    # part of forward(); only forward() is implemented here.

    print("KERNEL_OK")
</pallas_src>

<mosaic_0001>
module attributes {stable_mosaic.version = 11 : i64} {
  func.func @_gaussian_policy_kernel(%arg0: memref<2x8xf32, #tpu.memory_space<vmem>>, %arg1: memref<8x32xf32, #tpu.memory_space<vmem>>, %arg2: memref<32x32xf32, #tpu.memory_space<vmem>>, %arg3: memref<32x256xf32, #tpu.memory_space<vmem>>, %arg4: memref<3x256xf32, #tpu.memory_space<vmem>>, %arg5: memref<2x256xf32, #tpu.memory_space<vmem>>) attributes {dimension_semantics = [], scalar_prefetch = 0 : i64, scratch_operands = 0 : i64, tpu.core_type = #tpu.core_type<tc>} {
    %c0 = arith.constant 0 : index
    %c0_0 = arith.constant 0 : index
    %0 = vector.load %arg0[%c0, %c0_0] : memref<2x8xf32, #tpu.memory_space<vmem>>, vector<2x8xf32>
    %c0_1 = arith.constant 0 : index
    %c0_2 = arith.constant 0 : index
    %1 = vector.load %arg4[%c0_1, %c0_2] : memref<3x256xf32, #tpu.memory_space<vmem>>, vector<1x32xf32>
    %c1 = arith.constant 1 : index
    %c0_3 = arith.constant 0 : index
    %2 = vector.load %arg4[%c1, %c0_3] : memref<3x256xf32, #tpu.memory_space<vmem>>, vector<1x32xf32>
    %c2 = arith.constant 2 : index
    %c0_4 = arith.constant 0 : index
    %3 = vector.load %arg4[%c2, %c0_4] : memref<3x256xf32, #tpu.memory_space<vmem>>, vector<1x256xf32>
    %c0_5 = arith.constant 0 : index
    %c0_6 = arith.constant 0 : index
    %4 = vector.load %arg1[%c0_5, %c0_6] : memref<8x32xf32, #tpu.memory_space<vmem>>, vector<8x32xf32>
    %cst = arith.constant dense<0.000000e+00> : vector<2x32xf32>
    %5 = tpu.matmul %0, %4, %cst {dimension_numbers = #tpu.dot_dimension_numbers<[1], [0], [0], [1], [0, 0, 1, 1], [], []>} : vector<2x8xf32>, vector<8x32xf32>, vector<2x32xf32> -> vector<2x32xf32>
    %6 = vector.broadcast %1 : vector<1x32xf32> to vector<2x32xf32>
    %7 = arith.addf %5, %6 : vector<2x32xf32>
    %cst_7 = arith.constant 0.000000e+00 : f32
    %8 = vector.broadcast %cst_7 : f32 to vector<2x32xf32>
    %9 = arith.maximumf %7, %8 : vector<2x32xf32>
    %c0_8 = arith.constant 0 : index
    %c0_9 = arith.constant 0 : index
    %10 = vector.load %arg2[%c0_8, %c0_9] : memref<32x32xf32, #tpu.memory_space<vmem>>, vector<32x32xf32>
    %cst_10 = arith.constant dense<0.000000e+00> : vector<2x32xf32>
    %11 = tpu.matmul %9, %10, %cst_10 {dimension_numbers = #tpu.dot_dimension_numbers<[1], [0], [0], [1], [0, 0, 1, 1], [], []>} : vector<2x32xf32>, vector<32x32xf32>, vector<2x32xf32> -> vector<2x32xf32>
    %12 = vector.broadcast %2 : vector<1x32xf32> to vector<2x32xf32>
    %13 = arith.addf %11, %12 : vector<2x32xf32>
    %cst_11 = arith.constant 0.000000e+00 : f32
    %14 = vector.broadcast %cst_11 : f32 to vector<2x32xf32>
    %15 = arith.maximumf %13, %14 : vector<2x32xf32>
    %c0_12 = arith.constant 0 : index
    %c0_13 = arith.constant 0 : index
    %16 = vector.load %arg3[%c0_12, %c0_13] : memref<32x256xf32, #tpu.memory_space<vmem>>, vector<32x256xf32>
    %cst_14 = arith.constant dense<0.000000e+00> : vector<2x256xf32>
    %17 = tpu.matmul %15, %16, %cst_14 {dimension_numbers = #tpu.dot_dimension_numbers<[1], [0], [0], [1], [0, 0, 1, 1], [], []>} : vector<2x32xf32>, vector<32x256xf32>, vector<2x256xf32> -> vector<2x256xf32>
    %18 = vector.broadcast %3 : vector<1x256xf32> to vector<2x256xf32>
    %19 = arith.addf %17, %18 : vector<2x256xf32>
    %20 = tpu.iota {dimensions = array<i32: 1>} : vector<2x256xi32>
    %cst_15 = arith.constant -2.000000e+01 : f32
    %cst_16 = arith.constant 2.000000e+00 : f32
    %21 = vector.broadcast %cst_15 : f32 to vector<2x256xf32>
    %22 = arith.maximumf %21, %19 : vector<2x256xf32>
    %23 = vector.broadcast %cst_16 : f32 to vector<2x256xf32>
    %24 = arith.minimumf %23, %22 : vector<2x256xf32>
    %c128_i32 = arith.constant 128 : i32
    %25 = vector.broadcast %c128_i32 : i32 to vector<2x256xi32>
    %26 = arith.cmpi sge, %20, %25 : vector<2x256xi32>
    %27 = arith.select %26, %24, %19 : vector<2x256xi1>, vector<2x256xf32>
    %c0_17 = arith.constant 0 : index
    %c0_18 = arith.constant 0 : index
    %28 = vector.load %arg5[%c0_17, %c0_18] : memref<2x256xf32, #tpu.memory_space<vmem>>, vector<2x256xf32>
    tpu.vector_store %arg5[%c0_17, %c0_18], %27 {strides = array<i32>} : memref<2x256xf32, #tpu.memory_space<vmem>>, vector<2x256xf32>,
    return
  }
}

</mosaic_0001>

<bundles_post_ra>
// kernel: gaussian_policy_forward.1
= control target key start
LH: loop header
LB: loop body
LE: loop exit
PB: predicated region body
PF: predicated region fallthrough
CT: control target
= control target key end

     0   :  { %10 = vsyncpa [#allocation3], 0  ;;  %s436_s0 = inlined_call_operand.hbm [shape: f32[2,8], index: 0, kind: input, shape index: {}]   ;;  %s437_s1 = inlined_call_operand.hbm [shape: f32[8,32], index: 1, kind: input, shape index: {}]   ;;  %s438_s2 = inlined_call_operand.hbm [shape: f32[32,32], index: 2, kind: input, shape index: {}]   ;;  %s439_s3 = inlined_call_operand.hbm [shape: f32[32,256], index: 3, kind: input, shape index: {}]   ;;  %s440_s4 = inlined_call_operand.hbm [shape: f32[3,256], index: 4, kind: input, shape index: {}]   ;;  %s441_s5 = inlined_call_operand.vmem [shape: f32[2,256], index: 5, kind: output, shape index: {}]  }
   0x1   :  { %11 = vsyncpa [#allocation5], 0  ;;  %s29_s20 = sshll.u32 %s437_s1, 4  ;;  %s30_s20 = int_to_ptr.hbm [resolvable:$true] %s29_s20 }
   0x2   :  { %12 = vsyncpa [#allocation8], 0  ;;  %s376_s21 = smov [#allocation4]   ;;  %s52_s25 = sshll.u32 %s439_s3, 4  ;;  %s53_s25 = int_to_ptr.hbm [resolvable:$true] %s52_s25 }
   0x3   :  { %s31_s22 = sshll.u32 %s376_s21, 4  ;;  %s377_s26 = smov [#allocation7]   ;;  %s32_s22 = int_to_ptr.vmem [resolvable:$true] %s31_s22 }
   0x4   :  { %34 = dma.hbm_to_vmem [thread:$0]  %s30_s20, 128, %s32_s22, [#allocation5]  }
   0x5   :  { %s54_s27 = sshll.u32 %s377_s26, 4  ;;  %s378_s28 = smov 256   ;;  %s55_s27 = int_to_ptr.vmem [resolvable:$true] %s54_s27 }
   0x6   :  { %s379_s29 = smov 16   ;;  %s18_s1 = sshll.u32 %s436_s0, 4  ;;  %s19_s1 = int_to_ptr.hbm [resolvable:$true] %s18_s1 }
   0x7   :  { %60 = dma.hbm_to_vmem [thread:$0]  %s53_s25, 1024, %s55_s27, [#allocation8], %s378_s28, %s378_s28, %s379_s29  }
   0x8   :  { %s380_s7 = smov [#allocation2]   ;;  %s39_s3 = sshll.u32 %s438_s2, 4  ;;  %s40_s3 = int_to_ptr.hbm [resolvable:$true] %s39_s3 }
   0x9   :  { %s20_s8 = sshll.u32 %s380_s7, 4  ;;  %s381_s11 = smov [#allocation6]   ;;  %s21_s8 = int_to_ptr.vmem [resolvable:$true] %s20_s8 }
   0xa   :  { %23 = dma.hbm_to_vmem [thread:$0]  %s19_s1, 32, %s21_s8, [#allocation3]  }
   0xb   :  { %s41_s12 = sshll.u32 %s381_s11, 4  ;;  %s382_s13 = smov 128   ;;  %s42_s12 = int_to_ptr.vmem [resolvable:$true] %s41_s12 }
   0xc   :  { %s383_s14 = smov 8   ;;  %s66_s0 = sshll.u32 %s440_s4, 4  ;;  %s67_s0 = int_to_ptr.hbm [resolvable:$true] %s66_s0 }
   0xd   :  { %47 = dma.hbm_to_vmem [thread:$0]  %s40_s3, 512, %s42_s12, [#allocation5], %s382_s13, %s382_s13, %s383_s14  }
   0xe   :  { %s384_s17 = smov [#allocation9]  }
   0xf   :  { %s68_s18 = sshll.u32 %s384_s17, 4  ;;  %s69_s18 = int_to_ptr.vmem [resolvable:$true] %s68_s18 }
  0x10   :  { %71 = dma.hbm_to_vmem [thread:$0]  %s67_s0, 128, %s69_s18, [#allocation8]  }
  0x11   :  { %370 = dma.done.wait [#allocation3], 32  }
  0x12   :  { %371 = vsyncadd [#allocation3], 4294967264 }
  0x13   :  { %372 = dma.done.wait [#allocation5], 640  }
  0x14   :  { %373 = vsyncadd [#allocation5], 4294966656 }
  0x15   :  { %374 = dma.done.wait [#allocation8], 1152  }
  0x16   :  { %375 = vsyncadd [#allocation8], 4294966144  ;;  %vm99_vm0 = vcmask 64512   ;;  %v97_v0 = vld [vmem:[#allocation4] sm:$0xff]  ;;  %v92_v1 = vld [vmem:[#allocation2] sm:$0x3] }
  0x17   :  { %v127_v2 = vld [vmem:[#allocation6 + $0x18] sm:$0xff]  ;;  %118 = vmatpush.msra.mxu0 %v97_v0  ;;  %v126_v3 = vld [vmem:[#allocation6 + $0x10] sm:$0xff]  ;;  %v125_v4 = vld [vmem:[#allocation6 + $0x8] sm:$0xff]  ;;  %vm129_vm1 = vcmask 261120   ;;  %vm224_vm2 = vcmask 1041408  }
  0x18   :  { %145 = vmatpush.msra.mxu1 %v127_v2  ;;  %235 = vmatmul.msk.f32.vlgmr.msra.gmra.mxu0 %vm99_vm0, %v92_v1  ;;  %v124_v5 = vld [vmem:[#allocation6] sm:$0xff]  ;;  %v160_v6 = vld [vmem:[#allocation7 + $0x30] sm:$0xff]  ;;  %v161_v7 = vld [vmem:[#allocation7 + $0x38] sm:$0xff] }
  0x19   :  { %182 = vmatpush.msra.mxu2 %v160_v6  ;;  %202 = vmatpush.msra.mxu3 %v161_v7  ;;  %v248_v8 = vld [vmem:[#allocation9] ss:$0 sm:$0xff]  ;;  %v159_v13 = vld [vmem:[#allocation7 + $0x28] sm:$0xff]  ;;  %v156_v14 = vld [vmem:[#allocation7 + $0x10] sm:$0xff] }
  0x1a   :  { %146 = vmatpush.msra.mxu1 %v126_v3  ;;  %v158_v12 = vld [vmem:[#allocation7 + $0x20] sm:$0xff]  ;;  %v157_v15 = vld [vmem:[#allocation7 + $0x18] sm:$0xff]  ;;  %v155_v17 = vld [vmem:[#allocation7 + $0x8] sm:$0xff] }
  0x1b   :  { %183 = vmatpush.msra.mxu2 %v158_v12  ;;  %203 = vmatpush.msra.mxu3 %v159_v13  ;;  %v154_v16 = vld [vmem:[#allocation7] sm:$0xff] }
  0x1c   :  { %147 = vmatpush.msra.mxu1 %v125_v4  ;;  %v249_v18 = vld [vmem:[#allocation9 + $0x1] ss:$0 sm:$0xff]  ;;  %v96_v22 = vld [vmem:[#allocation9 + $0x2] ss:$4 sm:$0x3] }
  0x1d   :  { %184 = vmatpush.msra.mxu2 %v156_v14  ;;  %204 = vmatpush.msra.mxu3 %v157_v15  ;;  %v164_v23 = vperm.slane %v96_v22, 1  ;;  %v163_v26 = vperm.slane %v96_v22, 0 }
  0x1e   :  { %148 = vmatpush.msra.mxu1 %v124_v5 }
  0x1f   :  { %185 = vmatpush.msra.mxu2 %v154_v16  ;;  %205 = vmatpush.msra.mxu3 %v155_v17 }
  0x95   :  { %v120_v9 = vpop.f32.mrf.mxu0 }
  0x96   :  { %v121_v10 = vadd.f32 %v248_v8, %v120_v9 }
  0x98   :  { %v123_v11 = vmax.f32 %v121_v10, 0.0 }
  0x9a   :  { %236 = vmatmul.msk.f32.vlgmr.msra.gmra.mxu1 %vm129_vm1, %v123_v11 }
 0x117   :  { %v150_v19 = vpop.f32.mrf.mxu1 }
 0x118   :  { %v151_v20 = vadd.f32 %v249_v18, %v150_v19 }
 0x11a   :  { %v153_v21 = vmax.f32 %v151_v20, 0.0 }
 0x11c   :  { %237 = vmatmul.msk.f32.vlgmr.msra.gmra.mxu2 %vm129_vm1, %v153_v21  ;;  %238 = vmatmul.msk.f32.vlgmr.msra.gmra.mxu3 %vm129_vm1, %v153_v21 }
 0x19f   :  { %v207_v24 = vpop.f32.mrf.mxu3  ;;  %v187_v28 = vpop.f32.mrf.mxu2 }
 0x1a0   :  { %v208_v25 = vadd.f32 %v207_v24, %v164_v23  ;;  %v188_v30 = vadd.f32 %v187_v28, %v163_v26 }
 0x1a2   :  { %v214_v27 = vmax.f32 %v208_v25, -20.0 }
 0x1a4   :  { %v216_v29 = vmin.f32 %v214_v27, 2.0 }
 0x1a6   :  { %v223_v31 = vrot.slane %v216_v29, 6 }
 0x1a8   :  { %v225_v32 = vsel %vm224_vm2, %v188_v30, %v223_v31 }
 0x1a9   :  { %227 = vst [vmem:[%s441_s5] sm:$0xf] %v225_v32 }
 0x1aa   :  { %232 = vsyncpa [#allocation3], 1 }
 0x1ab   :  { %233 = vsyncpa [#allocation5], 1 }
 0x1ac   :  { %234 = vsyncpa [#allocation8], 1 }

</bundles_post_ra>
